<compile_context>
chip_gen: v5e
topology: v5e:2x2
jax: 0.10.0
libtpu: 0.0.40
codegen_flags: <defaults>
</compile_context>

<pallas_src>
import jax
import jax.numpy as jnp
import numpy as np
from jax.experimental import pallas as pl
from jax.experimental.pallas import tpu as pltpu


def _grouped_gather_kernel(ids_ref, expand_ref, fused_bd_ref, out_ref):
    # ids_ref:      (tr, G)     int32 node ids, G node rows folded per output row
    # expand_ref:   (G, G*V)    f32 indicator, expand[s, j] = (j // V == s)
    # fused_bd_ref: (G*V, G*C)  f32 block-diag fused table,
    #                           fused_bd[s*V + v, s*C + c] = F[v, c]
    # out_ref:      (tr, G*C)   lane-dense block of scores.t()   (G*C == 128)
    tr, g = ids_ref.shape
    gv = expand_ref.shape[1]
    v = gv // g

    ids_f = ids_ref[...].astype(jnp.float32)                      # (tr, G)
    # Replicate each id across its V-wide lane slot with a tiny MXU matmul
    # (exact: indicator weights x small-integer-valued f32).  Avoids any
    # in-kernel reshape / cross-lane relayout.
    ids_rep = jnp.dot(ids_f, expand_ref[...],
                      preferred_element_type=jnp.float32)         # (tr, G*V)

    lane_val = jax.lax.broadcasted_iota(jnp.int32, (tr, gv), 1) % v
    onehot = (ids_rep == lane_val.astype(jnp.float32)).astype(jnp.float32)

    # Single fused gather+classify matmul -> lane-dense output rows.
    out_ref[...] = jnp.dot(onehot, fused_bd_ref[...],
                           preferred_element_type=jnp.float32)


def _rowwise_gather_kernel(ids_ref, fused_ref, out_ref):
    # Fallback (only when num_classes does not divide 128): per-node rows,
    # (tn, C) output block -- still a single folded matmul.
    tn = ids_ref.shape[0]
    v = fused_ref.shape[0]
    lane = jax.lax.broadcasted_iota(jnp.int32, (tn, v), 1)
    onehot = (lane == ids_ref[...]).astype(jnp.float32)
    out_ref[...] = jnp.dot(onehot, fused_ref[...],
                           preferred_element_type=jnp.float32)


def diseases_classifier_forward(nodes, embed_table, weight_t, *, tile_nodes=8192):
    """Fused forward: returns scores.t() of shape (num_nodes, num_classes).

    nodes:       (N,)   int32 node ids
    embed_table: (V, D) encoder embedding table (row per node id)
    weight_t:    (D, C) classifier weight stored pre-transposed (= self.weight.t())
    """
    N = int(nodes.shape[0])
    V, D = embed_table.shape
    D2, C = weight_t.shape
    assert D == D2

    # Perf review #1: algebraic fold.  F[v, c] = sum_d T[v, d] * W[c, d].
    # Tiny (V x D x C); in a real model it is recomputed only on weight updates.
    fused = jnp.dot(embed_table, weight_t,
                    preferred_element_type=jnp.float32)            # (V, C)

    ids = nodes.astype(jnp.int32)

    if C > 128 or 128 % C != 0:
        # Fallback path for class counts that do not tile 128 lanes cleanly.
        ids2d = ids.reshape(N, 1)
        out_shape = jax.ShapeDtypeStruct((N, C), jnp.float32)
        if N <= tile_nodes:
            return pl.pallas_call(_rowwise_gather_kernel,
                                  out_shape=out_shape)(ids2d, fused)
        return pl.pallas_call(
            _rowwise_gather_kernel,
            out_shape=out_shape,
            grid=(pl.cdiv(N, tile_nodes),),
            in_specs=[pl.BlockSpec((tile_nodes, 1), lambda i: (i, 0)),
                      pl.BlockSpec((V, C), lambda i: (0, 0))],
            out_specs=pl.BlockSpec((tile_nodes, C), lambda i: (i, 0)),
            compiler_params=pltpu.CompilerParams(
                dimension_semantics=("parallel",)),
        )(ids2d, fused)

    # ---- main lane-dense path ----
    G = 128 // C                        # node rows folded per 128-lane output row
    GV = G * V
    R = -(-N // G)                      # grouped rows
    N_pad = R * G
    if N_pad != N:
        ids = jnp.concatenate([ids, jnp.zeros((N_pad - N,), jnp.int32)])
    ids2d = ids.reshape(R, G)           # contiguous reshape: free

    # Constant operands (VMEM-resident across the whole grid).
    expand = (jnp.arange(GV, dtype=jnp.int32)[None, :] // V
              == jnp.arange(G, dtype=jnp.int32)[:, None]).astype(jnp.float32)   # (G, GV)
    fused_bd = jnp.einsum('st,vc->svtc', jnp.eye(G, dtype=jnp.float32),
                          fused).reshape(GV, G * C)                             # (GV, 128)

    out_shape = jax.ShapeDtypeStruct((R, G * C), jnp.float32)
    tr = max((tile_nodes // G) // 8 * 8, 8)      # grouped rows per grid step

    if R <= tr:
        # Single shot: whole problem in VMEM, no grid / pipeline overhead.
        out = pl.pallas_call(_grouped_gather_kernel,
                             out_shape=out_shape)(ids2d, expand, fused_bd)
    else:
        out = pl.pallas_call(
            _grouped_gather_kernel,
            out_shape=out_shape,
            grid=(pl.cdiv(R, tr),),
            in_specs=[
                pl.BlockSpec((tr, G), lambda i: (i, 0)),        # streaming ids
                pl.BlockSpec((G, GV), lambda i: (0, 0)),        # constant
                pl.BlockSpec((GV, G * C), lambda i: (0, 0)),    # constant
            ],
            out_specs=pl.BlockSpec((tr, G * C), lambda i: (i, 0)),
            compiler_params=pltpu.CompilerParams(
                dimension_semantics=("parallel",),              # shards across TCs on v7x
                vmem_limit_bytes=32 * 1024 * 1024,
            ),
        )(ids2d, expand, fused_bd)

    # (R, G*C) -> (N_pad, C) is a contiguous row-major reshape (free view).
    return out.reshape(N_pad, C)[:N]


def xavier_uniform(key, shape):
    # matches torch.nn.init.xavier_uniform_ (gain=1) for a 2-D tensor
    fan_out, fan_in = shape
    bound = np.sqrt(6.0 / (fan_in + fan_out))
    return jax.random.uniform(key, shape, jnp.float32, -bound, bound)


if __name__ == "__main__":
    num_classes = 8
    embed_dim = 32
    num_nodes = 16
    vocab = 64   # synthetic encoder's embedding-table size

    key = jax.random.PRNGKey(0)
    k_w, k_tbl, k_nodes, k_nodes2 = jax.random.split(key, 4)

    # Parameters (deterministic synthetic init).  Layout chosen once at init:
    # weight stored as weight.t() = (D, C); encoder table row-major (vocab, D).
    weight = xavier_uniform(k_w, (num_classes, embed_dim))            # (C, D)
    weight_t = weight.T                                               # (D, C)
    embed_table = jax.random.normal(k_tbl, (vocab, embed_dim), jnp.float32)

    nodes = jax.random.randint(k_nodes, (num_nodes,), 0, vocab, dtype=jnp.int32)

    # Pure-JAX reference == PyTorch forward: (weight @ enc(nodes)).t()
    ref = embed_table[nodes] @ weight_t                               # (N, C)

    # 1) Single-shot (grid-less) lane-dense path at the module's nominal size.
    scores_t = diseases_classifier_forward(nodes, embed_table, weight_t)
    scores_t = jax.block_until_ready(scores_t)
    assert scores_t.shape == (num_nodes, num_classes)
    np.testing.assert_allclose(np.asarray(scores_t), np.asarray(ref),
                               rtol=1e-5, atol=1e-5)

    # 2) Tiled / parallel path incl. padding + a partial last block
    #    (N=1000 is not a multiple of G=16; tile_nodes=256 -> grid=(4,)).
    n_big = 1000
    nodes_big = jax.random.randint(k_nodes2, (n_big,), 0, vocab, dtype=jnp.int32)
    ref_big = embed_table[nodes_big] @ weight_t
    scores_big = diseases_classifier_forward(nodes_big, embed_table, weight_t,
                                             tile_nodes=256)
    scores_big = jax.block_until_ready(scores_big)
    assert scores_big.shape == (n_big, num_classes)
    np.testing.assert_allclose(np.asarray(scores_big), np.asarray(ref_big),
                               rtol=1e-5, atol=1e-5)

    print("KERNEL_OK")
</pallas_src>

<mosaic_0001>
module attributes {stable_mosaic.version = 11 : i64} {
  func.func @_grouped_gather_kernel(%arg0: memref<1x16xi32, #tpu.memory_space<vmem>>, %arg1: memref<16x1024xf32, #tpu.memory_space<vmem>>, %arg2: memref<1024x128xf32, #tpu.memory_space<vmem>>, %arg3: memref<1x128xf32, #tpu.memory_space<vmem>>) attributes {dimension_semantics = [], scalar_prefetch = 0 : i64, scratch_operands = 0 : i64, tpu.core_type = #tpu.core_type<tc>} {
    %c0 = arith.constant 0 : index
    %c0_0 = arith.constant 0 : index
    %0 = vector.load %arg0[%c0, %c0_0] : memref<1x16xi32, #tpu.memory_space<vmem>>, vector<1x16xi32>
    %1 = arith.sitofp %0 : vector<1x16xi32> to vector<1x16xf32>
    %c0_1 = arith.constant 0 : index
    %c0_2 = arith.constant 0 : index
    %2 = vector.load %arg1[%c0_1, %c0_2] : memref<16x1024xf32, #tpu.memory_space<vmem>>, vector<16x1024xf32>
    %cst = arith.constant dense<0.000000e+00> : vector<1x1024xf32>
    %3 = tpu.matmul %1, %2, %cst {dimension_numbers = #tpu.dot_dimension_numbers<[1], [0], [0], [1], [0, 0, 1, 1], [], []>} : vector<1x16xf32>, vector<16x1024xf32>, vector<1x1024xf32> -> vector<1x1024xf32>
    %4 = tpu.iota {dimensions = array<i32: 1>} : vector<1x1024xi32>
    %c64_i32 = arith.constant 64 : i32
    %c0_i32 = arith.constant 0 : i32
    %5 = arith.cmpi eq, %c64_i32, %c0_i32 : i32
    %c1_i32 = arith.constant 1 : i32
    %6 = arith.select %5, %c1_i32, %c64_i32 : i32
    %7 = vector.broadcast %6 : i32 to vector<1x1024xi32>
    %8 = arith.remsi %4, %7 : vector<1x1024xi32>
    %c0_i32_3 = arith.constant 0 : i32
    %9 = vector.broadcast %c0_i32_3 : i32 to vector<1x1024xi32>
    %10 = arith.cmpi ne, %8, %9 : vector<1x1024xi32>
    %c0_i32_4 = arith.constant 0 : i32
    %11 = vector.broadcast %c0_i32_4 : i32 to vector<1x1024xi32>
    %12 = arith.cmpi slt, %8, %11 : vector<1x1024xi32>
    %c0_i32_5 = arith.constant 0 : i32
    %13 = arith.cmpi slt, %6, %c0_i32_5 : i32
    %14 = vector.broadcast %13 : i1 to vector<1x1024xi1>
    %15 = vector.broadcast %14 : vector<1x1024xi1> to vector<1x1024xi1>
    %16 = arith.xori %12, %15 : vector<1x1024xi1>
    %17 = arith.andi %16, %10 : vector<1x1024xi1>
    %18 = vector.broadcast %6 : i32 to vector<1x1024xi32>
    %19 = arith.addi %8, %18 : vector<1x1024xi32>
    %20 = arith.select %17, %19, %8 : vector<1x1024xi1>, vector<1x1024xi32>
    %21 = arith.sitofp %20 : vector<1x1024xi32> to vector<1x1024xf32>
    %22 = arith.cmpf oeq, %3, %21 : vector<1x1024xf32>
    %23 = arith.extui %22 : vector<1x1024xi1> to vector<1x1024xi32>
    %24 = arith.sitofp %23 : vector<1x1024xi32> to vector<1x1024xf32>
    %c0_6 = arith.constant 0 : index
    %c0_7 = arith.constant 0 : index
    %25 = vector.load %arg2[%c0_6, %c0_7] : memref<1024x128xf32, #tpu.memory_space<vmem>>, vector<1024x128xf32>
    %cst_8 = arith.constant dense<0.000000e+00> : vector<1x128xf32>
    %26 = tpu.matmul %24, %25, %cst_8 {dimension_numbers = #tpu.dot_dimension_numbers<[1], [0], [0], [1], [0, 0, 1, 1], [], []>} : vector<1x1024xf32>, vector<1024x128xf32>, vector<1x128xf32> -> vector<1x128xf32>
    %c0_9 = arith.constant 0 : index
    %c0_10 = arith.constant 0 : index
    %27 = vector.load %arg3[%c0_9, %c0_10] : memref<1x128xf32, #tpu.memory_space<vmem>>, vector<1x128xf32>
    tpu.vector_store %arg3[%c0_9, %c0_10], %26 {strides = array<i32>} : memref<1x128xf32, #tpu.memory_space<vmem>>, vector<1x128xf32>,
    return
  }
}

</mosaic_0001>

<bundles_post_ra>
// kernel: tpu_custom_call.1
= control target key start
LH: loop header
LB: loop body
LE: loop exit
PB: predicated region body
PF: predicated region fallthrough
CT: control target
= control target key end

     0   :  { %8 = vsyncpa [#allocation3], 0  ;;  %s870_s0 = inlined_call_operand.hbm [shape: s32[1,16], index: 0, kind: input, shape index: {}]   ;;  %s871_s1 = inlined_call_operand.hbm [shape: f32[16,1024], index: 1, kind: input, shape index: {}]   ;;  %s872_s2 = inlined_call_operand.hbm [shape: f32[1024,128], index: 2, kind: input, shape index: {}]   ;;  %s873_s3 = inlined_call_operand.hbm [shape: f32[1,128], index: 3, kind: output, shape index: {}]  }
   0x1   :  { %9 = vsyncpa [#allocation6], 0  ;;  %s26_s14 = sshll.u32 %s871_s1, 4  ;;  %s27_s14 = int_to_ptr.hbm [resolvable:$true] %s26_s14 }
   0x2   :  { %10 = vsyncpa [#allocation4], 0  ;;  %s821_s15 = smov [#allocation5]   ;;  %s16_s19 = sshll.u32 %s870_s0, 4  ;;  %s17_s19 = int_to_ptr.hbm [resolvable:$true] %s16_s19 }
   0x3   :  { %s28_s16 = sshll.u32 %s821_s15, 4  ;;  %s822_s20 = smov 1024   ;;  %s29_s16 = int_to_ptr.vmem [resolvable:$true] %s28_s16 }
   0x4   :  { %s823_s21 = smov 64   ;;  %s824_s22 = smov [#allocation2]  }
   0x5   :  { %34 = dma.hbm_to_vmem [thread:$0]  %s27_s14, 2048, %s29_s16, [#allocation6], %s822_s20, %s822_s20, %s823_s21  }
   0x6   :  { %s18_s23 = sshll.u32 %s824_s22, 4  ;;  %s39_s26 = sshll.u32 %s872_s2, 4  ;;  %s19_s23 = int_to_ptr.vmem [resolvable:$true] %s18_s23  ;;  %s40_s26 = int_to_ptr.hbm [resolvable:$true] %s39_s26 }
   0x7   :  { %21 = dma.hbm_to_vmem [thread:$0]  %s17_s19, 16, %s19_s23, [#allocation3]  }
   0x8   :  { %s825_s1 = smov [#allocation7]   ;;  %s826_s28 = smov 128  }
   0x9   :  { %s41_s27 = sshll.u32 %s825_s1, 4  ;;  %s827_s29 = smov 8   ;;  %s42_s27 = int_to_ptr.vmem [resolvable:$true] %s41_s27 }
   0xa   :  { %47 = dma.hbm_to_vmem [thread:$0]  %s40_s26, 16384, %s42_s27, [#allocation6], %s826_s28, %s826_s28, %s827_s29  }
   0xb   :  { %815 = dma.done.wait [#allocation3], 16  }
   0xc   :  { %816 = vsyncadd [#allocation3], 4294967280 }
   0xd   :  { %817 = dma.done.wait [#allocation6], 18432  }
   0xe   :  { %818 = vsyncadd [#allocation6], 4294948864  ;;  %v72_v0 = vld [vmem:[#allocation5 + $0x50] sm:$0xff]  ;;  %v73_v2 = vld [vmem:[#allocation5 + $0x58] sm:$0xff]  ;;  %vm78_vm0 = vcmask 130048   ;;  %s829_s0 = smov [#allocation8]  }
   0xf   :  { %v64_v1 = vld [vmem:[#allocation5 + $0x10] sm:$0xff]  ;;  %136 = vmatpush.msra.mxu2 %v72_v0  ;;  %156 = vmatpush.msra.mxu3 %v73_v2  ;;  %v60_v3 = vld [vmem:[#allocation2] sm:$0x1]  ;;  %v70_v8 = vld [vmem:[#allocation5 + $0x40] sm:$0xff]  ;;  %s673_s2 = sshll.u32 %s829_s0, 4  ;;  %s675_s5 = sshll.u32 %s873_s3, 4  ;;  %s674_s2 = int_to_ptr.vmem [resolvable:$true] %s673_s2  ;;  %s676_s5 = int_to_ptr.hbm [resolvable:$true] %s675_s5 }
  0x10   :  { %v65_v4 = vld [vmem:[#allocation5 + $0x18] sm:$0xff]  ;;  %v61_v5 = vcvt.s32.f32 %v60_v3  ;;  %v76_v6 = vld [vmem:[#allocation5 + $0x70] sm:$0xff]  ;;  %v71_v9 = vld [vmem:[#allocation5 + $0x48] sm:$0xff]  ;;  %96 = vmatpush.msra.mxu0 %v70_v8 }
  0x11   :  { %v77_v7 = vld [vmem:[#allocation5 + $0x78] sm:$0xff]  ;;  %137 = vmatpush.msra.mxu2 %v64_v1  ;;  %157 = vmatpush.msra.mxu3 %v65_v4  ;;  %v68_v10 = vld [vmem:[#allocation5 + $0x30] sm:$0xff]  ;;  %v62_v12 = vld [vmem:[#allocation5] sm:$0xff] }
  0x12   :  { %688 = vmatmul.msk.f32.vlgmr.msra.gmra.mxu2 %vm78_vm0, %v61_v5  ;;  %689 = vmatmul.msk.f32.vlgmr.msra.gmra.mxu3 %vm78_vm0, %v61_v5  ;;  %v69_v11 = vld [vmem:[#allocation5 + $0x38] sm:$0xff]  ;;  %v63_v13 = vld [vmem:[#allocation5 + $0x8] sm:$0xff]  ;;  %v74_v14 = vld [vmem:[#allocation5 + $0x60] sm:$0xff] }
  0x13   :  { %216 = vmatpush.msrb.mxu2 %v76_v6  ;;  %236 = vmatpush.msrb.mxu3 %v77_v7  ;;  %v75_v15 = vld [vmem:[#allocation5 + $0x68] sm:$0xff]  ;;  %v426_v16 = vld [vmem:[#allocation7 + $0x178] sm:$0xff]  ;;  %v66_v18 = vld [vmem:[#allocation5 + $0x20] sm:$0xff] }
  0x14   :  { %116 = vmatpush.msra.mxu1 %v71_v9  ;;  %97 = vmatpush.msra.mxu0 %v62_v12  ;;  %v442_v17 = vld [vmem:[#allocation7 + $0x1f8] sm:$0xff]  ;;  %v67_v19 = vld [vmem:[#allocation5 + $0x28] sm:$0xff]  ;;  %v425_v21 = vld [vmem:[#allocation7 + $0x170] sm:$0xff] }
  0x15   :  { %217 = vmatpush.msrb.mxu2 %v68_v10  ;;  %237 = vmatpush.msrb.mxu3 %v69_v11  ;;  %v394_v20 = vld [vmem:[#allocation7 + $0x78] sm:$0xff]  ;;  %v441_v23 = vld [vmem:[#allocation7 + $0x1f0] sm:$0xff]  ;;  %v424_v25 = vld [vmem:[#allocation7 + $0x168] sm:$0xff] }
  0x16   :  { %117 = vmatpush.msra.mxu1 %v63_v13  ;;  %686 = vmatmul.msk.f32.vlgmr.msra.gmra.mxu0 %vm78_vm0, %v61_v5  ;;  %v410_v22 = vld [vmem:[#allocation7 + $0xf8] sm:$0xff]  ;;  %v393_v24 = vld [vmem:[#allocation7 + $0x70] sm:$0xff]  ;;  %v392_v26 = vld [vmem:[#allocation7 + $0x68] sm:$0xff] }
  0x17   :  { %687 = vmatmul.msk.f32.vlgmr.msra.gmra.mxu1 %vm78_vm0, %v61_v5  ;;  %176 = vmatpush.msrb.mxu0 %v74_v14  ;;  %v409_v27 = vld [vmem:[#allocation7 + $0xf0] sm:$0xff]  ;;  %v423_v28 = vld [vmem:[#allocation7 + $0x160] sm:$0xff]  ;;  %v440_v29 = vld [vmem:[#allocation7 + $0x1e8] sm:$0xff] }
  0x18   :  { %196 = vmatpush.msrb.mxu1 %v75_v15  ;;  %547 = vmatpush.msra.mxu2 %v426_v16  ;;  %v391_v30 = vld [vmem:[#allocation7 + $0x60] sm:$0xff]  ;;  %v408_v31 = vld [vmem:[#allocation7 + $0xe8] sm:$0xff]  ;;  %v422_v32 = vld [vmem:[#allocation7 + $0x158] sm:$0xff] }
  0x19   :  { %567 = vmatpush.msra.mxu3 %v442_v17  ;;  %177 = vmatpush.msrb.mxu0 %v66_v18  ;;  %v439_v33 = vld [vmem:[#allocation7 + $0x1e0] sm:$0xff]  ;;  %v390_v34 = vld [vmem:[#allocation7 + $0x58] sm:$0xff]  ;;  %v421_v36 = vld [vmem:[#allocation7 + $0x150] sm:$0xff] }
  0x1a   :  { %692 = vmatmul.msk.f32.vlgmr.msrb.gmra.mxu2 %vm78_vm0, %v61_v5  ;;  %693 = vmatmul.msk.f32.vlgmr.msrb.gmra.mxu3 %vm78_vm0, %v61_v5  ;;  %v407_v35 = vld [vmem:[#allocation7 + $0xe0] sm:$0xff]  ;;  %v438_v37 = vld [vmem:[#allocation7 + $0x1d8] sm:$0xff]  ;;  %v389_v38 = vld [vmem:[#allocation7 + $0x50] sm:$0xff] }
  0x1b   :  { %197 = vmatpush.msrb.mxu1 %v67_v19  ;;  %507 = vmatpush.msra.mxu0 %v394_v20  ;;  %v406_v39 = vld [vmem:[#allocation7 + $0xd8] sm:$0xff]  ;;  %v420_v40 = vld [vmem:[#allocation7 + $0x148] sm:$0xff]  ;;  %v437_v41 = vld [vmem:[#allocation7 + $0x1d0] sm:$0xff] }
  0x1c   :  { %548 = vmatpush.msra.mxu2 %v425_v21  ;;  %568 = vmatpush.msra.mxu3 %v441_v23  ;;  %v388_v42 = vld [vmem:[#allocation7 + $0x48] sm:$0xff]  ;;  %v405_v43 = vld [vmem:[#allocation7 + $0xd0] sm:$0xff]  ;;  %v419_v44 = vld [vmem:[#allocation7 + $0x140] sm:$0xff] }
  0x1d   :  { %527 = vmatpush.msra.mxu1 %v410_v22  ;;  %508 = vmatpush.msra.mxu0 %v393_v24  ;;  %v436_v45 = vld [vmem:[#allocation7 + $0x1c8] sm:$0xff]  ;;  %v387_v46 = vld [vmem:[#allocation7 + $0x40] sm:$0xff]  ;;  %v418_v48 = vld [vmem:[#allocation7 + $0x138] sm:$0xff] }
  0x1e   :  { %549 = vmatpush.msra.mxu2 %v424_v25  ;;  %690 = vmatmul.msk.f32.vlgmr.msrb.gmra.mxu0 %vm78_vm0, %v61_v5  ;;  %v404_v47 = vld [vmem:[#allocation7 + $0xc8] sm:$0xff]  ;;  %v435_v49 = vld [vmem:[#allocation7 + $0x1c0] sm:$0xff]  ;;  %v386_v50 = vld [vmem:[#allocation7 + $0x38] sm:$0xff] }
  0x1f   :  { %691 = vmatmul.msk.f32.vlgmr.msrb.gmra.mxu1 %vm78_vm0, %v61_v5  ;;  %509 = vmatpush.msra.mxu0 %v392_v26  ;;  %v403_v51 = vld [vmem:[#allocation7 + $0xc0] sm:$0xff]  ;;  %v417_v52 = vld [vmem:[#allocation7 + $0x130] sm:$0xff]  ;;  %v434_v53 = vld [vmem:[#allocation7 + $0x1b8] sm:$0xff] }
  0x20   :  { %528 = vmatpush.msra.mxu1 %v409_v27  ;;  %550 = vmatpush.msra.mxu2 %v423_v28  ;;  %v385_v54 = vld [vmem:[#allocation7 + $0x30] sm:$0xff]  ;;  %v402_v55 = vld [vmem:[#allocation7 + $0xb8] sm:$0xff]  ;;  %v416_v56 = vld [vmem:[#allocation7 + $0x128] sm:$0xff] }
  0x21   :  { %569 = vmatpush.msra.mxu3 %v440_v29  ;;  %510 = vmatpush.msra.mxu0 %v391_v30  ;;  %v433_v57 = vld [vmem:[#allocation7 + $0x1b0] sm:$0xff]  ;;  %v384_v58 = vld [vmem:[#allocation7 + $0x28] sm:$0xff]  ;;  %v415_v60 = vld [vmem:[#allocation7 + $0x120] sm:$0xff] }
  0x22   :  { %529 = vmatpush.msra.mxu1 %v408_v31  ;;  %551 = vmatpush.msra.mxu2 %v422_v32  ;;  %v401_v59 = vld [vmem:[#allocation7 + $0xb0] sm:$0xff]  ;;  %v432_v61 = vld [vmem:[#allocation7 + $0x1a8] sm:$0xff]  ;;  %v383_v62 = vld [vmem:[#allocation7 + $0x20] sm:$0xff] }
  0x23   :  { %570 = vmatpush.msra.mxu3 %v439_v33  ;;  %511 = vmatpush.msra.mxu0 %v390_v34  ;;  %v400_v63 = vld [vmem:[#allocation7 + $0xa8] sm:$0xff]  ;;  %v414_v0 = vld [vmem:[#allocation7 + $0x118] sm:$0xff]  ;;  %v431_v1 = vld [vmem:[#allocation7 + $0x1a0] sm:$0xff] }
  0x24   :  { %530 = vmatpush.msra.mxu1 %v407_v35  ;;  %552 = vmatpush.msra.mxu2 %v421_v36  ;;  %v382_v2 = vld [vmem:[#allocation7 + $0x18] sm:$0xff]  ;;  %v399_v3 = vld [vmem:[#allocation7 + $0xa0] sm:$0xff]  ;;  %v413_v4 = vld [vmem:[#allocation7 + $0x110] sm:$0xff] }
  0x25   :  { %571 = vmatpush.msra.mxu3 %v438_v37  ;;  %512 = vmatpush.msra.mxu0 %v389_v38  ;;  %v430_v5 = vld [vmem:[#allocation7 + $0x198] sm:$0xff]  ;;  %v381_v6 = vld [vmem:[#allocation7 + $0x10] sm:$0xff]  ;;  %v412_v8 = vld [vmem:[#allocation7 + $0x108] sm:$0xff] }
  0x26   :  { %531 = vmatpush.msra.mxu1 %v406_v39  ;;  %553 = vmatpush.msra.mxu2 %v420_v40  ;;  %v398_v7 = vld [vmem:[#allocation7 + $0x98] sm:$0xff]  ;;  %v429_v9 = vld [vmem:[#allocation7 + $0x190] sm:$0xff]  ;;  %v380_v10 = vld [vmem:[#allocation7 + $0x8] sm:$0xff] }
  0x27   :  { %572 = vmatpush.msra.mxu3 %v437_v41  ;;  %513 = vmatpush.msra.mxu0 %v388_v42  ;;  %v397_v11 = vld [vmem:[#allocation7 + $0x90] sm:$0xff]  ;;  %v411_v12 = vld [vmem:[#allocation7 + $0x100] sm:$0xff]  ;;  %v428_v13 = vld [vmem:[#allocation7 + $0x188] sm:$0xff] }
  0x28   :  { %532 = vmatpush.msra.mxu1 %v405_v43  ;;  %554 = vmatpush.msra.mxu2 %v419_v44  ;;  %v490_v14 = vld [vmem:[#allocation7 + $0x378] sm:$0xff]  ;;  %v379_v15 = vld [vmem:[#allocation7] sm:$0xff]  ;;  %v396_v16 = vld [vmem:[#allocation7 + $0x88] sm:$0xff] }
  0x29   :  { %573 = vmatpush.msra.mxu3 %v436_v45  ;;  %514 = vmatpush.msra.mxu0 %v387_v46  ;;  %v427_v17 = vld [vmem:[#allocation7 + $0x180] sm:$0xff]  ;;  %v458_v18 = vld [vmem:[#allocation7 + $0x278] sm:$0xff]  ;;  %v489_v19 = vld [vmem:[#allocation7 + $0x370] sm:$0xff] }
  0x2a   :  { %533 = vmatpush.msra.mxu1 %v404_v47  ;;  %555 = vmatpush.msra.mxu2 %v418_v48  ;;  %v506_v20 = vld [vmem:[#allocation7 + $0x3f8] sm:$0xff]  ;;  %v395_v21 = vld [vmem:[#allocation7 + $0x80] sm:$0xff]  ;;  %v457_v22 = vld [vmem:[#allocation7 + $0x270] sm:$0xff] }
  0x2b   :  { %574 = vmatpush.msra.mxu3 %v435_v49  ;;  %515 = vmatpush.msra.mxu0 %v386_v50  ;;  %v474_v23 = vld [vmem:[#allocation7 + $0x2f8] sm:$0xff]  ;;  %v488_v24 = vld [vmem:[#allocation7 + $0x368] sm:$0xff]  ;;  %v505_v25 = vld [vmem:[#allocation7 + $0x3f0] sm:$0xff] }
  0x2c   :  { %534 = vmatpush.msra.mxu1 %v403_v51  ;;  %556 = vmatpush.msra.mxu2 %v417_v52  ;;  %v456_v26 = vld [vmem:[#allocation7 + $0x268] sm:$0xff]  ;;  %v473_v27 = vld [vmem:[#allocation7 + $0x2f0] sm:$0xff]  ;;  %v487_v28 = vld [vmem:[#allocation7 + $0x360] sm:$0xff] }
  0x2d   :  { %575 = vmatpush.msra.mxu3 %v434_v53  ;;  %516 = vmatpush.msra.mxu0 %v385_v54  ;;  %v504_v29 = vld [vmem:[#allocation7 + $0x3e8] sm:$0xff]  ;;  %v455_v30 = vld [vmem:[#allocation7 + $0x260] sm:$0xff]  ;;  %v486_v32 = vld [vmem:[#allocation7 + $0x358] sm:$0xff] }
  0x2e   :  { %535 = vmatpush.msra.mxu1 %v402_v55  ;;  %557 = vmatpush.msra.mxu2 %v416_v56  ;;  %v472_v31 = vld [vmem:[#allocation7 + $0x2e8] sm:$0xff]  ;;  %v503_v33 = vld [vmem:[#allocation7 + $0x3e0] sm:$0xff]  ;;  %v454_v34 = vld [vmem:[#allocation7 + $0x258] sm:$0xff] }
  0x2f   :  { %576 = vmatpush.msra.mxu3 %v433_v57  ;;  %517 = vmatpush.msra.mxu0 %v384_v58  ;;  %v471_v35 = vld [vmem:[#allocation7 + $0x2e0] sm:$0xff]  ;;  %v485_v36 = vld [vmem:[#allocation7 + $0x350] sm:$0xff]  ;;  %v502_v37 = vld [vmem:[#allocation7 + $0x3d8] sm:$0xff] }
  0x30   :  { %536 = vmatpush.msra.mxu1 %v401_v59  ;;  %558 = vmatpush.msra.mxu2 %v415_v60  ;;  %v453_v38 = vld [vmem:[#allocation7 + $0x250] sm:$0xff]  ;;  %v470_v39 = vld [vmem:[#allocation7 + $0x2d8] sm:$0xff]  ;;  %v484_v40 = vld [vmem:[#allocation7 + $0x348] sm:$0xff] }
  0x31   :  { %577 = vmatpush.msra.mxu3 %v432_v61  ;;  %518 = vmatpush.msra.mxu0 %v383_v62  ;;  %v501_v41 = vld [vmem:[#allocation7 + $0x3d0] sm:$0xff]  ;;  %v452_v42 = vld [vmem:[#allocation7 + $0x248] sm:$0xff]  ;;  %v483_v44 = vld [vmem:[#allocation7 + $0x340] sm:$0xff] }
  0x32   :  { %537 = vmatpush.msra.mxu1 %v400_v63  ;;  %559 = vmatpush.msra.mxu2 %v414_v0  ;;  %v469_v43 = vld [vmem:[#allocation7 + $0x2d0] sm:$0xff]  ;;  %v500_v45 = vld [vmem:[#allocation7 + $0x3c8] sm:$0xff]  ;;  %v451_v46 = vld [vmem:[#allocation7 + $0x240] sm:$0xff] }
  0x33   :  { %578 = vmatpush.msra.mxu3 %v431_v1  ;;  %519 = vmatpush.msra.mxu0 %v382_v2  ;;  %v468_v47 = vld [vmem:[#allocation7 + $0x2c8] sm:$0xff]  ;;  %v482_v48 = vld [vmem:[#allocation7 + $0x338] sm:$0xff]  ;;  %v499_v49 = vld [vmem:[#allocation7 + $0x3c0] sm:$0xff] }
  0x34   :  { %538 = vmatpush.msra.mxu1 %v399_v3  ;;  %560 = vmatpush.msra.mxu2 %v413_v4  ;;  %v450_v50 = vld [vmem:[#allocation7 + $0x238] sm:$0xff]  ;;  %v467_v51 = vld [vmem:[#allocation7 + $0x2c0] sm:$0xff]  ;;  %v481_v52 = vld [vmem:[#allocation7 + $0x330] sm:$0xff] }
  0x35   :  { %579 = vmatpush.msra.mxu3 %v430_v5  ;;  %520 = vmatpush.msra.mxu0 %v381_v6  ;;  %v498_v53 = vld [vmem:[#allocation7 + $0x3b8] sm:$0xff]  ;;  %v449_v54 = vld [vmem:[#allocation7 + $0x230] sm:$0xff]  ;;  %v480_v56 = vld [vmem:[#allocation7 + $0x328] sm:$0xff] }
  0x36   :  { %539 = vmatpush.msra.mxu1 %v398_v7  ;;  %561 = vmatpush.msra.mxu2 %v412_v8  ;;  %v466_v55 = vld [vmem:[#allocation7 + $0x2b8] sm:$0xff]  ;;  %v497_v57 = vld [vmem:[#allocation7 + $0x3b0] sm:$0xff]  ;;  %v448_v58 = vld [vmem:[#allocation7 + $0x228] sm:$0xff] }
  0x37   :  { %580 = vmatpush.msra.mxu3 %v429_v9  ;;  %521 = vmatpush.msra.mxu0 %v380_v10  ;;  %v465_v59 = vld [vmem:[#allocation7 + $0x2b0] sm:$0xff]  ;;  %v479_v60 = vld [vmem:[#allocation7 + $0x320] sm:$0xff]  ;;  %v496_v61 = vld [vmem:[#allocation7 + $0x3a8] sm:$0xff] }
  0x38   :  { %540 = vmatpush.msra.mxu1 %v397_v11  ;;  %562 = vmatpush.msra.mxu2 %v411_v12  ;;  %v447_v62 = vld [vmem:[#allocation7 + $0x220] sm:$0xff]  ;;  %v464_v63 = vld [vmem:[#allocation7 + $0x2a8] sm:$0xff]  ;;  %v478_v0 = vld [vmem:[#allocation7 + $0x318] sm:$0xff] }
  0x39   :  { %581 = vmatpush.msra.mxu3 %v428_v13  ;;  %522 = vmatpush.msra.mxu0 %v379_v15  ;;  %v495_v1 = vld [vmem:[#allocation7 + $0x3a0] sm:$0xff]  ;;  %v446_v2 = vld [vmem:[#allocation7 + $0x218] sm:$0xff]  ;;  %v477_v4 = vld [vmem:[#allocation7 + $0x310] sm:$0xff] }
  0x3a   :  { %627 = vmatpush.msrb.mxu2 %v490_v14  ;;  %541 = vmatpush.msra.mxu1 %v396_v16  ;;  %v463_v3 = vld [vmem:[#allocation7 + $0x2a0] sm:$0xff]  ;;  %v494_v5 = vld [vmem:[#allocation7 + $0x398] sm:$0xff]  ;;  %v445_v6 = vld [vmem:[#allocation7 + $0x210] sm:$0xff] }
  0x3b   :  { %582 = vmatpush.msra.mxu3 %v427_v17  ;;  %587 = vmatpush.msrb.mxu0 %v458_v18  ;;  %v462_v7 = vld [vmem:[#allocation7 + $0x298] sm:$0xff]  ;;  %v476_v8 = vld [vmem:[#allocation7 + $0x308] sm:$0xff]  ;;  %v493_v9 = vld [vmem:[#allocation7 + $0x390] sm:$0xff]  ;;  %v242_v18 = vlaneseq }
  0x3c   :  { %628 = vmatpush.msrb.mxu2 %v489_v19  ;;  %542 = vmatpush.msra.mxu1 %v395_v21  ;;  %v444_v10 = vld [vmem:[#allocation7 + $0x208] sm:$0xff]  ;;  %v461_v11 = vld [vmem:[#allocation7 + $0x290] sm:$0xff]  ;;  %v475_v12 = vld [vmem:[#allocation7 + $0x300] sm:$0xff] }
  0x3d   :  { %647 = vmatpush.msrb.mxu3 %v506_v20  ;;  %588 = vmatpush.msrb.mxu0 %v457_v22  ;;  %v492_v13 = vld [vmem:[#allocation7 + $0x388] sm:$0xff]  ;;  %v443_v14 = vld [vmem:[#allocation7 + $0x200] sm:$0xff]  ;;  %v243_v19 = vand.u32 127, %v242_v18 }
  0x3e   :  { %607 = vmatpush.msrb.mxu1 %v474_v23  ;;  %629 = vmatpush.msrb.mxu2 %v488_v24  ;;  %v460_v15 = vld [vmem:[#allocation7 + $0x288] sm:$0xff]  ;;  %v491_v16 = vld [vmem:[#allocation7 + $0x380] sm:$0xff] }
  0x3f   :  { %648 = vmatpush.msrb.mxu3 %v505_v25  ;;  %589 = vmatpush.msrb.mxu0 %v456_v26  ;;  %v459_v17 = vld [vmem:[#allocation7 + $0x280] sm:$0xff]  ;;  %v244_v20 = vadd.s32 128, %v243_v19  ;;  %v245_v21 = vadd.s32 256, %v243_v19  ;;  %v246_v22 = vadd.s32 384, %v243_v19  ;;  %v255_v23 = vand.u32 63, %v243_v19 }
  0x40   :  { %608 = vmatpush.msrb.mxu1 %v473_v27  ;;  %630 = vmatpush.msrb.mxu2 %v487_v28 }
  0x41   :  { %649 = vmatpush.msrb.mxu3 %v504_v29  ;;  %590 = vmatpush.msrb.mxu0 %v455_v30  ;;  %v262_v24 = vand.u32 63, %v244_v20  ;;  %v269_v25 = vand.u32 63, %v245_v21  ;;  %v276_v26 = vand.u32 63, %v246_v22  ;;  %v347_v27 = vcvt.s32.f32 %v255_v23 }
  0x42   :  { %609 = vmatpush.msrb.mxu1 %v472_v31  ;;  %631 = vmatpush.msrb.mxu2 %v486_v32  ;;  %v247_v29 = vadd.s32 512, %v243_v19  ;;  %v248_v30 = vadd.s32 640, %v243_v19 }
  0x43   :  { %650 = vmatpush.msrb.mxu3 %v503_v33  ;;  %591 = vmatpush.msrb.mxu0 %v454_v34  ;;  %v348_v28 = vcvt.s32.f32 %v262_v24  ;;  %v349_v31 = vcvt.s32.f32 %v269_v25  ;;  %v350_v32 = vcvt.s32.f32 %v276_v26  ;;  %v249_v33 = vadd.s32 768, %v243_v19 }
  0x44   :  { %610 = vmatpush.msrb.mxu1 %v471_v35  ;;  %632 = vmatpush.msrb.mxu2 %v485_v36  ;;  %v250_v34 = vadd.s32 896, %v243_v19 }
  0x45   :  { %651 = vmatpush.msrb.mxu3 %v502_v37  ;;  %592 = vmatpush.msrb.mxu0 %v453_v38 }
  0x46   :  { %611 = vmatpush.msrb.mxu1 %v470_v39  ;;  %633 = vmatpush.msrb.mxu2 %v484_v40  ;;  %v283_v39 = vand.u32 63, %v247_v29  ;;  %v290_v40 = vand.u32 63, %v248_v30 }
  0x47   :  { %652 = vmatpush.msrb.mxu3 %v501_v41  ;;  %593 = vmatpush.msrb.mxu0 %v452_v42  ;;  %v828_v41 = vmov 1.0   ;;  %v297_v42 = vand.u32 63, %v249_v33 }
  0x48   :  { %612 = vmatpush.msrb.mxu1 %v469_v43  ;;  %634 = vmatpush.msrb.mxu2 %v483_v44  ;;  %v304_v43 = vand.u32 63, %v250_v34  ;;  %v351_v44 = vcvt.s32.f32 %v283_v39 }
  0x49   :  { %653 = vmatpush.msrb.mxu3 %v500_v45  ;;  %594 = vmatpush.msrb.mxu0 %v451_v46  ;;  %v352_v45 = vcvt.s32.f32 %v290_v40  ;;  %v353_v46 = vcvt.s32.f32 %v297_v42 }
  0x4a   :  { %613 = vmatpush.msrb.mxu1 %v468_v47  ;;  %635 = vmatpush.msrb.mxu2 %v482_v48  ;;  %v354_v47 = vcvt.s32.f32 %v304_v43 }
  0x4b   :  { %654 = vmatpush.msrb.mxu3 %v499_v49  ;;  %595 = vmatpush.msrb.mxu0 %v450_v50 }
  0x4c   :  { %614 = vmatpush.msrb.mxu1 %v467_v51  ;;  %636 = vmatpush.msrb.mxu2 %v481_v52 }
  0x4d   :  { %655 = vmatpush.msrb.mxu3 %v498_v53  ;;  %596 = vmatpush.msrb.mxu0 %v449_v54 }
  0x4e   :  { %615 = vmatpush.msrb.mxu1 %v466_v55  ;;  %637 = vmatpush.msrb.mxu2 %v480_v56 }
  0x4f   :  { %656 = vmatpush.msrb.mxu3 %v497_v57  ;;  %597 = vmatpush.msrb.mxu0 %v448_v58 }
  0x50   :  { %616 = vmatpush.msrb.mxu1 %v465_v59  ;;  %638 = vmatpush.msrb.mxu2 %v479_v60 }
  0x51   :  { %657 = vmatpush.msrb.mxu3 %v496_v61  ;;  %598 = vmatpush.msrb.mxu0 %v447_v62 }
  0x52   :  { %617 = vmatpush.msrb.mxu1 %v464_v63  ;;  %639 = vmatpush.msrb.mxu2 %v478_v0 }
  0x53   :  { %658 = vmatpush.msrb.mxu3 %v495_v1  ;;  %599 = vmatpush.msrb.mxu0 %v446_v2 }
  0x54   :  { %618 = vmatpush.msrb.mxu1 %v463_v3  ;;  %640 = vmatpush.msrb.mxu2 %v477_v4 }
  0x55   :  { %659 = vmatpush.msrb.mxu3 %v494_v5  ;;  %600 = vmatpush.msrb.mxu0 %v445_v6 }
  0x56   :  { %619 = vmatpush.msrb.mxu1 %v462_v7  ;;  %641 = vmatpush.msrb.mxu2 %v476_v8 }
  0x57   :  { %660 = vmatpush.msrb.mxu3 %v493_v9  ;;  %601 = vmatpush.msrb.mxu0 %v444_v10 }
  0x58   :  { %620 = vmatpush.msrb.mxu1 %v461_v11  ;;  %642 = vmatpush.msrb.mxu2 %v475_v12 }
  0x59   :  { %661 = vmatpush.msrb.mxu3 %v492_v13  ;;  %602 = vmatpush.msrb.mxu0 %v443_v14 }
  0x5a   :  { %621 = vmatpush.msrb.mxu1 %v460_v15 }
  0x5b   :  { %662 = vmatpush.msrb.mxu3 %v491_v16 }
  0x5c   :  { %622 = vmatpush.msrb.mxu1 %v459_v17 }
  0x93   :  { %v99_v35 = vpop.f32.mrf.mxu0 }
  0x94   :  { %v119_v36 = vpop.f32.mrf.mxu1  ;;  %vm355_vm1 = vcmp.eq.f32.partialorder %v99_v35, %v347_v27 }
  0x95   :  { %v139_v37 = vpop.f32.mrf.mxu2  ;;  %vm356_vm2 = vcmp.eq.f32.partialorder %v119_v36, %v348_v28  ;;  %v159_v38 = vpop.f32.mrf.mxu3  ;;  %702 = vmatmul.msk.f32.vlgmr.msra.gmra.mxu0 %vm355_vm1, %v828_v41 }
  0x96   :  { %vm357_vm3 = vcmp.eq.f32.partialorder %v139_v37, %v349_v31  ;;  %vm358_vm4 = vcmp.eq.f32.partialorder %v159_v38, %v350_v32  ;;  %703 = vmatmul.msk.f32.vlgmr.msra.gmra.mxu1 %vm356_vm2, %v828_v41 }
  0x97   :  { %704 = vmatmul.msk.f32.vlgmr.msra.gmra.mxu2 %vm357_vm3, %v828_v41  ;;  %705 = vmatmul.msk.f32.vlgmr.msra.gmra.mxu3 %vm358_vm4, %v828_v41 }
  0x9b   :  { %v179_v48 = vpop.f32.mrf.mxu0 }
  0x9c   :  { %v199_v49 = vpop.f32.mrf.mxu1  ;;  %vm359_vm5 = vcmp.eq.f32.partialorder %v179_v48, %v351_v44 }
  0x9d   :  { %v219_v50 = vpop.f32.mrf.mxu2  ;;  %v239_v51 = vpop.f32.mrf.mxu3  ;;  %vm360_vm6 = vcmp.eq.f32.partialorder %v199_v49, %v352_v45  ;;  %706 = vmatmul.msk.f32.vlgmr.msrb.gmra.mxu0 %vm359_vm5, %v828_v41 }
  0x9e   :  { %vm361_vm7 = vcmp.eq.f32.partialorder %v219_v50, %v353_v46  ;;  %vm362_vm8 = vcmp.eq.f32.partialorder %v239_v51, %v354_v47  ;;  %707 = vmatmul.msk.f32.vlgmr.msrb.gmra.mxu1 %vm360_vm6, %v828_v41 }
  0x9f   :  { %708 = vmatmul.msk.f32.vlgmr.msrb.gmra.mxu2 %vm361_vm7, %v828_v41  ;;  %709 = vmatmul.msk.f32.vlgmr.msrb.gmra.mxu3 %vm362_vm8, %v828_v41 }
 0x112   :  { %v524_v52 = vpop.f32.mrf.mxu0 }
 0x113   :  { %v544_v53 = vpop.f32.mrf.mxu1 }
 0x114   :  { %v545_v54 = vadd.f32 %v544_v53, %v524_v52 }
 0x11a   :  { %v564_v55 = vpop.f32.mrf.mxu2  ;;  %v584_v56 = vpop.f32.mrf.mxu3 }
 0x11b   :  { %v565_v57 = vadd.f32 %v564_v55, %v545_v54  ;;  %v604_v58 = vpop.f32.mrf.mxu0  ;;  %v624_v60 = vpop.f32.mrf.mxu1 }
 0x11d   :  { %v585_v59 = vadd.f32 %v584_v56, %v565_v57 }
 0x11f   :  { %v605_v61 = vadd.f32 %v604_v58, %v585_v59 }
 0x121   :  { %v625_v62 = vadd.f32 %v624_v60, %v605_v61 }
 0x122   :  { %v644_v63 = vpop.f32.mrf.mxu2  ;;  %v664_v0 = vpop.f32.mrf.mxu3 }
 0x123   :  { %v645_v1 = vadd.f32 %v644_v63, %v625_v62 }
 0x125   :  { %v665_v2 = vadd.f32 %v664_v0, %v645_v1 }
 0x127   :  { %667 = vst [vmem:[#allocation8] sm:$0x1] %v665_v2 }
 0x128   :  { %678 = dma.vmem_to_hbm [thread:$0]  %s674_s2, 16, %s676_s5, [#allocation4]  }
 0x129   :  { %819 = dma.done.wait [#allocation4], 16  }
 0x12a   :  { %820 = vsyncadd [#allocation4], 4294967280 }
 0x12b   :  { %683 = vsyncpa [#allocation3], 1 }
 0x12c   :  { %684 = vsyncpa [#allocation6], 1 }
 0x12d   :  { %685 = vsyncpa [#allocation4], 1 }

</bundles_post_ra>
